<compile_context>
chip_gen: v7x
topology: tpu7x:2x2x1
jax: 0.10.0
libtpu: 0.0.40
codegen_flags: <defaults>
</compile_context>

<pallas_src>
import functools

import jax
import jax.numpy as jnp
from jax.experimental import pallas as pl
from jax.experimental.pallas import tpu as pltpu

D_IN = 28 * 28          # 784 (no K padding: block last dim == full array dim)
D_HID = 256
N_CLS = 10
N_PAD = 128             # lane-dense padded class dim


def _mlp_kernel(x_ref, tgt_ref, w1_ref, b1_ref, w2_ref, b2_ref,
                probs_ref, nll_ref):
    # ---- fc1 + ReLU (bf16 MXU matmul, f32 accumulation & elementwise) ----
    h = jnp.dot(x_ref[...], w1_ref[...],
                preferred_element_type=jnp.float32)             # (TB, 256) f32
    h = jnp.maximum(h + b1_ref[...], 0.0)

    # ---- fc2 (bf16 operands, f32 accum), padded to 128 output lanes ----
    logits = jnp.dot(h.astype(w2_ref.dtype), w2_ref[...],
                     preferred_element_type=jnp.float32)
    logits = logits + b2_ref[...]                               # (TB, 128) f32

    lane = jax.lax.broadcasted_iota(jnp.int32, logits.shape, 1)
    valid = lane < N_CLS                                        # real classes

    # ---- softmax over the 10 real classes (module output) ----
    logits_m = jnp.where(valid, logits, -jnp.inf)
    m = jnp.max(logits_m, axis=1, keepdims=True)
    e = jnp.exp(logits_m - m)                                   # padded -> 0
    inv_denom = pl.reciprocal(jnp.sum(e, axis=1, keepdims=True), approx=True)
    probs = e * inv_denom                                       # (TB, 128) f32
    probs_ref[...] = probs.astype(probs_ref.dtype)              # bf16 store

    # ---- CrossEntropyLoss(probs, target):
    #      log_softmax applied *again* to probs (10 real lanes), then NLL ----
    probs_m = jnp.where(valid, probs, -jnp.inf)
    m2 = jnp.max(probs_m, axis=1, keepdims=True)
    lse = jnp.log(jnp.sum(jnp.exp(probs_m - m2), axis=1, keepdims=True)) + m2
    logp = probs - lse                                          # (TB, 128)

    # Selection mask from int32 targets.  Padded batch rows carry target = -1
    # (matches no lane) and padded class lanes are never selected, so both
    # contribute exactly zero to the partial sums.
    onehot = (lane == tgt_ref[...]).astype(jnp.float32)         # (TB, 128)
    # Per-lane partial NLL sums over this batch tile: (1, 1, 128).
    nll_ref[...] = -jnp.sum(onehot * logp, axis=0, keepdims=True)[None]


def _round_up(n, m):
    return ((n + m - 1) // m) * m


@functools.partial(jax.jit, static_argnames=("tile_b",))
def mlp_forward(x_nchw, target, w1, b1, w2, b2, *, tile_b=1024):
    """Returns (probs, loss) matching the PyTorch MLP.forward."""
    B = x_nchw.shape[0]

    # Batch tile: multiple of 8.  On chips with 2 TensorCores (v7x) make sure
    # the "parallel" grid axis has at least 2 tiles once B >= 16.
    TB = _round_up(min(tile_b, B), 8)
    if B >= 16:
        TB = min(TB, _round_up(-(-B // 2), 8))
    B_pad = _round_up(B, TB)
    num_tiles = B_pad // TB

    # ---- wrapper-side layout prep: cast to bf16 first, single batch-only pad
    # (no K padding, no f32 padded intermediate). ----
    x2d = x_nchw.reshape(B, D_IN).astype(jnp.bfloat16)          # x.view(-1, 784)
    x2d = jnp.pad(x2d, ((0, B_pad - B), (0, 0)))

    tgt = jnp.pad(target.astype(jnp.int32), (0, B_pad - B),
                  constant_values=-1).reshape(B_pad, 1)

    w1p = w1.astype(jnp.bfloat16)                               # (784, 256)
    b1p = b1.reshape(1, D_HID).astype(jnp.float32)
    w2p = jnp.pad(w2, ((0, 0), (0, N_PAD - N_CLS))).astype(jnp.bfloat16)
    b2p = jnp.pad(b2, (0, N_PAD - N_CLS)).reshape(1, N_PAD).astype(jnp.float32)

    cost = pl.CostEstimate(
        flops=2 * B_pad * (D_IN * D_HID + D_HID * N_PAD),
        transcendentals=3 * B_pad * N_PAD,
        bytes_accessed=(x2d.size * 2 + tgt.size * 4
                        + w1p.size * 2 + w2p.size * 2
                        + b1p.size * 4 + b2p.size * 4
                        + B_pad * N_PAD * 2 + num_tiles * N_PAD * 4),
    )

    grid_spec = pltpu.PrefetchScalarGridSpec(
        num_scalar_prefetch=0,
        grid=(num_tiles,),
        in_specs=[
            pl.BlockSpec((TB, D_IN), lambda i: (i, 0)),           # x tile
            pl.BlockSpec((TB, 1), lambda i: (i, 0)),              # targets tile
            pl.BlockSpec((D_IN, D_HID), lambda i: (0, 0)),        # w1 (resident)
            pl.BlockSpec((1, D_HID), lambda i: (0, 0)),           # b1 (resident)
            pl.BlockSpec((D_HID, N_PAD), lambda i: (0, 0)),       # w2 (resident)
            pl.BlockSpec((1, N_PAD), lambda i: (0, 0)),           # b2 (resident)
        ],
        out_specs=[
            pl.BlockSpec((TB, N_PAD), lambda i: (i, 0)),          # probs (bf16)
            pl.BlockSpec((1, 1, N_PAD), lambda i: (i, 0, 0)),     # NLL lane sums
        ],
    )

    probs_pad, nll_partials = pl.pallas_call(
        _mlp_kernel,
        out_shape=(
            jax.ShapeDtypeStruct((B_pad, N_PAD), jnp.bfloat16),
            jax.ShapeDtypeStruct((num_tiles, 1, N_PAD), jnp.float32),
        ),
        grid_spec=grid_spec,
        compiler_params=pltpu.CompilerParams(
            dimension_semantics=("parallel",)),
        cost_estimate=cost,
    )(x2d, tgt, w1p, b1p, w2p, b2p)

    probs = probs_pad[:B, :N_CLS].astype(jnp.float32)
    loss = jnp.sum(nll_partials) / B
    return probs, loss


def init_params(key):
    """Deterministic init mimicking nn.Linear default (U(-1/sqrt(fan_in), ..))."""
    k1, k2, k3, k4 = jax.random.split(key, 4)
    lim1 = 1.0 / (D_IN ** 0.5)
    lim2 = 1.0 / (D_HID ** 0.5)
    # stored as (in, out) so the kernel computes x @ W
    w1 = jax.random.uniform(k1, (D_IN, D_HID), jnp.float32, -lim1, lim1)
    b1 = jax.random.uniform(k2, (D_HID,), jnp.float32, -lim1, lim1)
    w2 = jax.random.uniform(k3, (D_HID, N_CLS), jnp.float32, -lim2, lim2)
    b2 = jax.random.uniform(k4, (N_CLS,), jnp.float32, -lim2, lim2)
    return w1, b1, w2, b2


def _reference(x_nchw, target, w1, b1, w2, b2):
    """Pure-JAX f32 reference for validation (same double-softmax semantics)."""
    x = x_nchw.reshape(x_nchw.shape[0], D_IN)
    h = jax.nn.relu(x @ w1 + b1)
    probs = jax.nn.softmax(h @ w2 + b2, axis=1)
    logp = jax.nn.log_softmax(probs, axis=1)
    loss = -jnp.mean(jnp.take_along_axis(logp, target[:, None], axis=1))
    return probs, loss


if __name__ == "__main__":
    key = jax.random.PRNGKey(0)
    kx, kt, kp = jax.random.split(key, 3)

    B = 8
    x = jax.random.normal(kx, (B, 1, 28, 28), jnp.float32)      # NCHW, like MNIST
    target = jax.random.randint(kt, (B,), 0, N_CLS, jnp.int32)
    w1, b1, w2, b2 = init_params(kp)

    probs, loss = mlp_forward(x, target, w1, b1, w2, b2)
    jax.block_until_ready((probs, loss))

    probs_ref, loss_ref = _reference(x, target, w1, b1, w2, b2)
    assert probs.shape == (B, N_CLS)
    # rows of the returned softmax must sum to 1 (bf16 store + approx
    # reciprocal -> slightly loosened tolerance)
    assert jnp.allclose(jnp.sum(probs, axis=1), 1.0, atol=1e-2)
    # bf16 matmul operands / bf16 probs -> compare against the f32 reference
    # with a correspondingly loosened tolerance.
    assert jnp.allclose(probs, probs_ref, atol=2e-2, rtol=2e-2)
    assert jnp.allclose(loss, loss_ref, atol=2e-2, rtol=2e-2)

    print("KERNEL_OK")
</pallas_src>

<mosaic_0001>
module attributes {stable_mosaic.version = 11 : i64} {
  func.func @_mlp_kernel(%arg0: i32, %arg1: memref<8x784xbf16, #tpu.memory_space<vmem>>, %arg2: memref<8x1xi32, #tpu.memory_space<vmem>>, %arg3: memref<784x256xbf16, #tpu.memory_space<vmem>>, %arg4: memref<1x256xf32, #tpu.memory_space<vmem>>, %arg5: memref<256x128xbf16, #tpu.memory_space<vmem>>, %arg6: memref<1x128xf32, #tpu.memory_space<vmem>>, %arg7: memref<8x128xbf16, #tpu.memory_space<vmem>>, %arg8: memref<1x1x128xf32, #tpu.memory_space<vmem>>) attributes {dimension_semantics = [#tpu.dimension_semantics<parallel>], iteration_bounds = array<i64: 1>, scalar_prefetch = 0 : i64, scratch_operands = 0 : i64, tpu.core_type = #tpu.core_type<tc>, window_params = [{transform_indices = @transform_0, window_bounds = array<i64: 8, 784>}, {transform_indices = @transform_1, window_bounds = array<i64: 8, 1>}, {pipeline_mode = #tpu.pipeline_mode<synchronous>, transform_indices = @transform_2, window_bounds = array<i64: 784, 256>}, {pipeline_mode = #tpu.pipeline_mode<synchronous>, transform_indices = @transform_3, window_bounds = array<i64: 1, 256>}, {pipeline_mode = #tpu.pipeline_mode<synchronous>, transform_indices = @transform_4, window_bounds = array<i64: 256, 128>}, {pipeline_mode = #tpu.pipeline_mode<synchronous>, transform_indices = @transform_5, window_bounds = array<i64: 1, 128>}, {transform_indices = @transform_6, window_bounds = array<i64: 8, 128>}, {transform_indices = @transform_7, window_bounds = array<i64: 1, 1, 128>}]} {
    %c0 = arith.constant 0 : index
    %c0_0 = arith.constant 0 : index
    %0 = vector.load %arg1[%c0, %c0_0] : memref<8x784xbf16, #tpu.memory_space<vmem>>, vector<8x784xbf16>
    %c0_1 = arith.constant 0 : index
    %c0_2 = arith.constant 0 : index
    %1 = vector.load %arg3[%c0_1, %c0_2] : memref<784x256xbf16, #tpu.memory_space<vmem>>, vector<784x256xbf16>
    %cst = arith.constant dense<0.000000e+00> : vector<8x256xf32>
    %2 = tpu.matmul %0, %1, %cst {dimension_numbers = #tpu.dot_dimension_numbers<[1], [0], [0], [1], [0, 0, 1, 1], [], []>} : vector<8x784xbf16>, vector<784x256xbf16>, vector<8x256xf32> -> vector<8x256xf32>
    %c0_3 = arith.constant 0 : index
    %c0_4 = arith.constant 0 : index
    %3 = vector.load %arg4[%c0_3, %c0_4] : memref<1x256xf32, #tpu.memory_space<vmem>>, vector<1x256xf32>
    %4 = vector.broadcast %3 : vector<1x256xf32> to vector<8x256xf32>
    %5 = arith.addf %2, %4 : vector<8x256xf32>
    %cst_5 = arith.constant 0.000000e+00 : f32
    %6 = vector.broadcast %cst_5 : f32 to vector<8x256xf32>
    %7 = arith.maximumf %5, %6 : vector<8x256xf32>
    %8 = arith.truncf %7 : vector<8x256xf32> to vector<8x256xbf16>
    %c0_6 = arith.constant 0 : index
    %c0_7 = arith.constant 0 : index
    %9 = vector.load %arg5[%c0_6, %c0_7] : memref<256x128xbf16, #tpu.memory_space<vmem>>, vector<256x128xbf16>
    %cst_8 = arith.constant dense<0.000000e+00> : vector<8x128xf32>
    %10 = tpu.matmul %8, %9, %cst_8 {dimension_numbers = #tpu.dot_dimension_numbers<[1], [0], [0], [1], [0, 0, 1, 1], [], []>} : vector<8x256xbf16>, vector<256x128xbf16>, vector<8x128xf32> -> vector<8x128xf32>
    %c0_9 = arith.constant 0 : index
    %c0_10 = arith.constant 0 : index
    %11 = vector.load %arg6[%c0_9, %c0_10] : memref<1x128xf32, #tpu.memory_space<vmem>>, vector<1x128xf32>
    %12 = vector.broadcast %11 : vector<1x128xf32> to vector<8x128xf32>
    %13 = arith.addf %10, %12 : vector<8x128xf32>
    %14 = tpu.iota {dimensions = array<i32: 1>} : vector<8x128xi32>
    %c10_i32 = arith.constant 10 : i32
    %15 = vector.broadcast %c10_i32 : i32 to vector<8x128xi32>
    %16 = arith.cmpi slt, %14, %15 : vector<8x128xi32>
    %cst_11 = arith.constant 0xFF800000 : f32
    %17 = vector.broadcast %cst_11 : f32 to vector<8x128xf32>
    %18 = arith.select %16, %13, %17 : vector<8x128xi1>, vector<8x128xf32>
    %cst_12 = arith.constant dense<0xFF800000> : vector<8xf32>
    %19 = vector.multi_reduction <maximumf>, %18, %cst_12 [1] : vector<8x128xf32> to vector<8xf32>
    %20 = vector.shape_cast %19 : vector<8xf32> to vector<8x1xf32>
    %21 = vector.broadcast %20 : vector<8x1xf32> to vector<8x128xf32>
    %22 = arith.subf %18, %21 : vector<8x128xf32>
    %23 = math.exp %22 : vector<8x128xf32>
    %cst_13 = arith.constant dense<0.000000e+00> : vector<8xf32>
    %24 = vector.multi_reduction <add>, %23, %cst_13 [1] : vector<8x128xf32> to vector<8xf32>
    %25 = vector.shape_cast %24 : vector<8xf32> to vector<8x1xf32>
    %26 = tpu.reciprocal %25 {approx = true} : vector<8x1xf32> -> vector<8x1xf32>
    %27 = vector.broadcast %26 : vector<8x1xf32> to vector<8x128xf32>
    %28 = arith.mulf %23, %27 : vector<8x128xf32>
    %29 = arith.truncf %28 : vector<8x128xf32> to vector<8x128xbf16>
    %c0_14 = arith.constant 0 : index
    %c0_15 = arith.constant 0 : index
    %30 = vector.load %arg7[%c0_14, %c0_15] : memref<8x128xbf16, #tpu.memory_space<vmem>>, vector<8x128xbf16>
    tpu.vector_store %arg7[%c0_14, %c0_15], %29 {strides = array<i32>} : memref<8x128xbf16, #tpu.memory_space<vmem>>, vector<8x128xbf16>,
    %cst_16 = arith.constant 0xFF800000 : f32
    %31 = vector.broadcast %cst_16 : f32 to vector<8x128xf32>
    %32 = arith.select %16, %28, %31 : vector<8x128xi1>, vector<8x128xf32>
    %cst_17 = arith.constant dense<0xFF800000> : vector<8xf32>
    %33 = vector.multi_reduction <maximumf>, %32, %cst_17 [1] : vector<8x128xf32> to vector<8xf32>
    %34 = vector.shape_cast %33 : vector<8xf32> to vector<8x1xf32>
    %35 = vector.broadcast %34 : vector<8x1xf32> to vector<8x128xf32>
    %36 = arith.subf %32, %35 : vector<8x128xf32>
    %37 = math.exp %36 : vector<8x128xf32>
    %cst_18 = arith.constant dense<0.000000e+00> : vector<8xf32>
    %38 = vector.multi_reduction <add>, %37, %cst_18 [1] : vector<8x128xf32> to vector<8xf32>
    %39 = vector.shape_cast %38 : vector<8xf32> to vector<8x1xf32>
    %40 = math.log %39 : vector<8x1xf32>
    %41 = arith.addf %40, %34 : vector<8x1xf32>
    %42 = vector.broadcast %41 : vector<8x1xf32> to vector<8x128xf32>
    %43 = arith.subf %28, %42 : vector<8x128xf32>
    %c0_19 = arith.constant 0 : index
    %c0_20 = arith.constant 0 : index
    %44 = vector.load %arg2[%c0_19, %c0_20] : memref<8x1xi32, #tpu.memory_space<vmem>>, vector<8x1xi32>
    %45 = vector.broadcast %44 : vector<8x1xi32> to vector<8x128xi32>
    %46 = arith.cmpi eq, %14, %45 : vector<8x128xi32>
    %47 = arith.extui %46 : vector<8x128xi1> to vector<8x128xi32>
    %48 = arith.sitofp %47 : vector<8x128xi32> to vector<8x128xf32>
    %49 = arith.mulf %48, %43 : vector<8x128xf32>
    %cst_21 = arith.constant dense<0.000000e+00> : vector<128xf32>
    %50 = vector.multi_reduction <add>, %49, %cst_21 [0] : vector<8x128xf32> to vector<128xf32>
    %51 = vector.shape_cast %50 : vector<128xf32> to vector<1x128xf32>
    %52 = vector.shape_cast %51 : vector<1x128xf32> to vector<1x1x128xf32>
    %cst_22 = arith.constant 0.000000e+00 : f32
    %53 = vector.broadcast %cst_22 : f32 to vector<1x1x128xf32>
    %54 = arith.subf %53, %52 : vector<1x1x128xf32>
    %c0_23 = arith.constant 0 : index
    %c0_24 = arith.constant 0 : index
    %c0_25 = arith.constant 0 : index
    %55 = vector.load %arg8[%c0_23, %c0_24, %c0_25] : memref<1x1x128xf32, #tpu.memory_space<vmem>>, vector<1x1x128xf32>
    tpu.vector_store %arg8[%c0_23, %c0_24, %c0_25], %54 {strides = array<i32>} : memref<1x1x128xf32, #tpu.memory_space<vmem>>, vector<1x1x128xf32>,
    return
  }
  func.func @transform_0(%arg0: i32) -> (i32, i32) {
    %c0_i32 = arith.constant 0 : i32
    %c0_i32_0 = arith.constant 0 : i32
    return %arg0, %c0_i32 : i32, i32
  }
  func.func @transform_1(%arg0: i32) -> (i32, i32) {
    %c0_i32 = arith.constant 0 : i32
    %c0_i32_0 = arith.constant 0 : i32
    return %arg0, %c0_i32 : i32, i32
  }
  func.func @transform_2(%arg0: i32) -> (i32, i32) {
    %c0_i32 = arith.constant 0 : i32
    %c0_i32_0 = arith.constant 0 : i32
    %c0_i32_1 = arith.constant 0 : i32
    return %c0_i32, %c0_i32_0 : i32, i32
  }
  func.func @transform_3(%arg0: i32) -> (i32, i32) {
    %c0_i32 = arith.constant 0 : i32
    %c0_i32_0 = arith.constant 0 : i32
    %c0_i32_1 = arith.constant 0 : i32
    return %c0_i32, %c0_i32_0 : i32, i32
  }
  func.func @transform_4(%arg0: i32) -> (i32, i32) {
    %c0_i32 = arith.constant 0 : i32
    %c0_i32_0 = arith.constant 0 : i32
    %c0_i32_1 = arith.constant 0 : i32
    return %c0_i32, %c0_i32_0 : i32, i32
  }
  func.func @transform_5(%arg0: i32) -> (i32, i32) {
    %c0_i32 = arith.constant 0 : i32
    %c0_i32_0 = arith.constant 0 : i32
    %c0_i32_1 = arith.constant 0 : i32
    return %c0_i32, %c0_i32_0 : i32, i32
  }
  func.func @transform_6(%arg0: i32) -> (i32, i32) {
    %c0_i32 = arith.constant 0 : i32
    %c0_i32_0 = arith.constant 0 : i32
    return %arg0, %c0_i32 : i32, i32
  }
  func.func @transform_7(%arg0: i32) -> (i32, i32, i32) {
    %c0_i32 = arith.constant 0 : i32
    %c0_i32_0 = arith.constant 0 : i32
    %c0_i32_1 = arith.constant 0 : i32
    return %arg0, %c0_i32, %c0_i32_0 : i32, i32, i32
  }
}

</mosaic_0001>

<bundles_post_ra>
// kernel: mlp_forward.1
= control target key start
LH: loop header
LB: loop body
LE: loop exit
PB: predicated region body
PF: predicated region fallthrough
CT: control target
= control target key end

     0   :  { %v1389_v1 = vmov 0   ;;  %vm654_vm0 = vcmask 130048   ;;  %s1814_s2 = inlined_call_operand.vmem [shape: bf16[784,256], index: 2, kind: input, shape index: {}]   ;;  %s1815_s0 = inlined_call_operand.vmem [shape: bf16[8,784], index: 0, kind: input, shape index: {}]   ;;  %s1816_s4 = inlined_call_operand.vmem [shape: bf16[256,128], index: 4, kind: input, shape index: {}]   ;;  %s1817_s3 = inlined_call_operand.vmem [shape: f32[1,256], index: 3, kind: input, shape index: {}]   ;;  %s1818_s5 = inlined_call_operand.vmem [shape: f32[1,128], index: 5, kind: input, shape index: {}]   ;;  %s1819_s6 = inlined_call_operand.vmem [shape: bf16[8,128], index: 6, kind: output, shape index: {0}]   ;;  %s1820_s1 = inlined_call_operand.vmem [shape: s32[8,1], index: 1, kind: input, shape index: {}]   ;;  %s1821_s7 = inlined_call_operand.vmem [shape: f32[1,1,128], index: 7, kind: output, shape index: {1}]  }
   0x1   :  { %v1211_v0 = vld [vmem:[%s1814_s2 + $0x104] ss:$8 sps:$4 sm:$0xff]   ;;  %1210 = vset.pattern.permute.xlu0 %v1389_v1  ;;  %v1213_v2 = vld [vmem:[%s1814_s2 + $0x100] ss:$8 sps:$4 sm:$0xff]   ;;  %v1214_v3 = vld [vmem:[%s1814_s2 + $0x114] ss:$8 sps:$4 sm:$0xff]  }
   0x2   :  { %699 = vmatprep.subr.bf16.mxu0 %v1211_v0  ;;  %v1216_v4 = vld [vmem:[%s1814_s2 + $0x110] ss:$8 sps:$4 sm:$0xff]   ;;  %v1217_v5 = vld [vmem:[%s1814_s2 + $0x124] ss:$8 sps:$4 sm:$0xff]   ;;  %v1219_v6 = vld [vmem:[%s1814_s2 + $0x120] ss:$8 sps:$4 sm:$0xff]  }
   0x3   :  { %700 = vmatpush1.bf16.msra.mxu0 %v1213_v2  ;;  %v1220_v7 = vld [vmem:[%s1814_s2 + $0x134] ss:$8 sps:$4 sm:$0xff]   ;;  %v1222_v8 = vld [vmem:[%s1814_s2 + $0x130] ss:$8 sps:$4 sm:$0xff]   ;;  %v1223_v9 = vld [vmem:[%s1814_s2 + $0x144] ss:$8 sps:$4 sm:$0xff]  }
   0x4   :  { %701 = vmatprep.subr.bf16.mxu0 %v1214_v3  ;;  %v1225_v10 = vld [vmem:[%s1814_s2 + $0x140] ss:$8 sps:$4 sm:$0xff]   ;;  %v1226_v11 = vld [vmem:[%s1814_s2 + $0x154] ss:$8 sps:$4 sm:$0xff]   ;;  %v1228_v12 = vld [vmem:[%s1814_s2 + $0x150] ss:$8 sps:$4 sm:$0xff]  }
   0x5   :  { %v1253_v13 = vld [vmem:[%s1814_s2 + $0x4] ss:$8 sps:$4 sm:$0xff]   ;;  %v1255_v14 = vld [vmem:[%s1814_s2] ss:$8 sps:$4 sm:$0xff]   ;;  %v1259_v16 = vld [vmem:[%s1814_s2 + $0x14] ss:$8 sps:$4 sm:$0xff]  }
   0x6   :  { %v1229_v15 = vld [vmem:[%s1814_s2 + $0x164] ss:$8 sps:$4 sm:$0xff]   ;;  %658 = vmatprep.subr.bf16.mxu1 %v1253_v13  ;;  %v1261_v17 = vld [vmem:[%s1814_s2 + $0x10] ss:$8 sps:$4 sm:$0xff]   ;;  %v1231_v18 = vld [vmem:[%s1814_s2 + $0x160] ss:$8 sps:$4 sm:$0xff]  }
   0x7   :  { %702 = vmatpush1.bf16.msra.mxu0 %v1216_v4  ;;  %659 = vmatpush1.bf16.msra.mxu1 %v1255_v14  ;;  %v1232_v19 = vld [vmem:[%s1814_s2 + $0x174] ss:$8 sps:$4 sm:$0xff]   ;;  %v1265_v20 = vld [vmem:[%s1814_s2 + $0x24] ss:$8 sps:$4 sm:$0xff]   ;;  %v1267_v22 = vld [vmem:[%s1814_s2 + $0x20] ss:$8 sps:$4 sm:$0xff]  }
   0x8   :  { %703 = vmatprep.subr.bf16.mxu0 %v1217_v5  ;;  %660 = vmatprep.subr.bf16.mxu1 %v1259_v16  ;;  %v1495_v21 = vld [vmem:[%s1815_s0 + $0x8] sm:$0xff]  ;;  %v1234_v24 = vld [vmem:[%s1814_s2 + $0x170] ss:$8 sps:$4 sm:$0xff]   ;;  %v1274_v26 = vld [vmem:[%s1814_s2 + $0x34] ss:$8 sps:$4 sm:$0xff]  }
   0x9   :  { %v1055_v23 = vcombine.high %v1495_v21, %v1495_v21  ;;  %v1235_v25 = vld [vmem:[%s1814_s2 + $0x184] ss:$8 sps:$4 sm:$0xff]   ;;  %v1276_v27 = vld [vmem:[%s1814_s2 + $0x30] ss:$8 sps:$4 sm:$0xff]   ;;  %v1237_v28 = vld [vmem:[%s1814_s2 + $0x180] ss:$8 sps:$4 sm:$0xff]   ;;  %v1054_v59 = vcombine.low %v1495_v21, %v1495_v21 }
   0xa   :  { %v1280_v29 = vld [vmem:[%s1814_s2 + $0x44] ss:$8 sps:$4 sm:$0xff]   ;;  %v1238_v30 = vld [vmem:[%s1814_s2 + $0x194] ss:$8 sps:$4 sm:$0xff]   ;;  %v1282_v31 = vld [vmem:[%s1814_s2 + $0x40] ss:$8 sps:$4 sm:$0xff]  }
   0xb   :  { %704 = vmatpush1.bf16.msra.mxu0 %v1219_v6  ;;  %661 = vmatpush1.bf16.msra.mxu1 %v1261_v17  ;;  %v1240_v32 = vld [vmem:[%s1814_s2 + $0x190] ss:$8 sps:$4 sm:$0xff]   ;;  %v1286_v33 = vld [vmem:[%s1814_s2 + $0x54] ss:$8 sps:$4 sm:$0xff]   ;;  %v1241_v34 = vld [vmem:[%s1814_s2 + $0x1a4] ss:$8 sps:$4 sm:$0xff]  }
   0xc   :  { %705 = vmatprep.subr.bf16.mxu0 %v1220_v7  ;;  %662 = vmatprep.subr.bf16.mxu1 %v1265_v20  ;;  %v1288_v35 = vld [vmem:[%s1814_s2 + $0x50] ss:$8 sps:$4 sm:$0xff]   ;;  %v1243_v36 = vld [vmem:[%s1814_s2 + $0x1a0] ss:$8 sps:$4 sm:$0xff]   ;;  %v1292_v37 = vld [vmem:[%s1814_s2 + $0x64] ss:$8 sps:$4 sm:$0xff]  }
   0xd   :  { %731 = vmatprep.mubr.bf16.mxu0 %v1055_v23  ;;  %v1244_v38 = vld [vmem:[%s1814_s2 + $0x1b4] ss:$8 sps:$4 sm:$0xff]   ;;  %v1294_v39 = vld [vmem:[%s1814_s2 + $0x60] ss:$8 sps:$4 sm:$0xff]   ;;  %v1246_v40 = vld [vmem:[%s1814_s2 + $0x1b0] ss:$8 sps:$4 sm:$0xff]  }
   0xe   :  { %v1298_v41 = vld [vmem:[%s1814_s2 + $0x74] ss:$8 sps:$4 sm:$0xff]   ;;  %v1247_v42 = vld [vmem:[%s1814_s2 + $0x1c4] ss:$8 sps:$4 sm:$0xff]   ;;  %v1300_v43 = vld [vmem:[%s1814_s2 + $0x70] ss:$8 sps:$4 sm:$0xff]  }
   0xf   :  { %706 = vmatpush1.bf16.msra.mxu0 %v1222_v8  ;;  %663 = vmatpush1.bf16.msra.mxu1 %v1267_v22  ;;  %v1249_v44 = vld [vmem:[%s1814_s2 + $0x1c0] ss:$8 sps:$4 sm:$0xff]   ;;  %v1304_v45 = vld [vmem:[%s1814_s2 + $0x84] ss:$8 sps:$4 sm:$0xff]   ;;  %v1250_v46 = vld [vmem:[%s1814_s2 + $0x1d4] ss:$8 sps:$4 sm:$0xff]  }
  0x10   :  { %707 = vmatprep.subr.bf16.mxu0 %v1223_v9  ;;  %664 = vmatprep.subr.bf16.mxu1 %v1274_v26  ;;  %v1306_v47 = vld [vmem:[%s1814_s2 + $0x80] ss:$8 sps:$4 sm:$0xff]   ;;  %v1252_v48 = vld [vmem:[%s1814_s2 + $0x1d0] ss:$8 sps:$4 sm:$0xff]   ;;  %v1310_v49 = vld [vmem:[%s1814_s2 + $0x94] ss:$8 sps:$4 sm:$0xff]  }
  0x11   :  { %v1256_v50 = vld [vmem:[%s1814_s2 + $0x1e4] ss:$8 sps:$4 sm:$0xff]   ;;  %v1312_v51 = vld [vmem:[%s1814_s2 + $0x90] ss:$8 sps:$4 sm:$0xff]   ;;  %v1258_v52 = vld [vmem:[%s1814_s2 + $0x1e0] ss:$8 sps:$4 sm:$0xff]  }
  0x12   :  { %v1316_v53 = vld [vmem:[%s1814_s2 + $0xa4] ss:$8 sps:$4 sm:$0xff]   ;;  %v1262_v54 = vld [vmem:[%s1814_s2 + $0x1f4] ss:$8 sps:$4 sm:$0xff]   ;;  %v1318_v55 = vld [vmem:[%s1814_s2 + $0xa0] ss:$8 sps:$4 sm:$0xff]  }
  0x13   :  { %708 = vmatpush1.bf16.msra.mxu0 %v1225_v10  ;;  %665 = vmatpush1.bf16.msra.mxu1 %v1276_v27  ;;  %v1264_v56 = vld [vmem:[%s1814_s2 + $0x1f0] ss:$8 sps:$4 sm:$0xff]   ;;  %v1322_v57 = vld [vmem:[%s1814_s2 + $0xb4] ss:$8 sps:$4 sm:$0xff]   ;;  %v1273_v58 = vld [vmem:[%s1814_s2 + $0x204] ss:$8 sps:$4 sm:$0xff]  }
  0x14   :  { %709 = vmatprep.subr.bf16.mxu0 %v1226_v11  ;;  %666 = vmatprep.subr.bf16.mxu1 %v1280_v29  ;;  %v1324_v60 = vld [vmem:[%s1814_s2 + $0xb0] ss:$8 sps:$4 sm:$0xff]   ;;  %v26_v61 = vld [vmem:[%s1815_s0] sm:$0xff]  ;;  %v1279_v2 = vld [vmem:[%s1814_s2 + $0x214] ss:$8 sps:$4 sm:$0xff]  }
  0x15   :  { %v1271_v62 = vld [vmem:[%s1814_s2 + $0x200] ss:$8 sps:$4 sm:$0xff]   ;;  %v1328_v63 = vld [vmem:[%s1814_s2 + $0xc4] ss:$8 sps:$4 sm:$0xff]   ;;  %v1053_v0 = vcombine.high %v26_v61, %v26_v61  ;;  %v1277_v3 = vld [vmem:[%s1814_s2 + $0x210] ss:$8 sps:$4 sm:$0xff]   ;;  %v1052_v21 = vcombine.low %v26_v61, %v26_v61 }
  0x16   :  { %v1330_v4 = vld [vmem:[%s1814_s2 + $0xc0] ss:$8 sps:$4 sm:$0xff]   ;;  %v1633_v5 = vld [vmem:[%s1815_s0 + $0x10] sm:$0xff]  ;;  %v1285_v8 = vld [vmem:[%s1814_s2 + $0x224] ss:$8 sps:$4 sm:$0xff]  }
  0x17   :  { %710 = vmatpush1.bf16.msra.mxu0 %v1228_v12  ;;  %667 = vmatpush1.bf16.msra.mxu1 %v1282_v31  ;;  %v1334_v6 = vld [vmem:[%s1814_s2 + $0xd4] ss:$8 sps:$4 sm:$0xff]   ;;  %v1057_v7 = vcombine.high %v1633_v5, %v1633_v5  ;;  %v1283_v9 = vld [vmem:[%s1814_s2 + $0x220] ss:$8 sps:$4 sm:$0xff]   ;;  %v1336_v11 = vld [vmem:[%s1814_s2 + $0xd0] ss:$8 sps:$4 sm:$0xff]  }
  0x18   :  { %711 = vmatprep.subr.bf16.mxu0 %v1229_v15  ;;  %668 = vmatprep.subr.bf16.mxu1 %v1286_v33  ;;  %v1291_v10 = vld [vmem:[%s1814_s2 + $0x234] ss:$8 sps:$4 sm:$0xff]   ;;  %v1340_v12 = vld [vmem:[%s1814_s2 + $0xe4] ss:$8 sps:$4 sm:$0xff]   ;;  %v1342_v13 = vld [vmem:[%s1814_s2 + $0xe0] ss:$8 sps:$4 sm:$0xff]  }
  0x19   :  { %690 = vmatprep.mubr.bf16.mxu1 %v1053_v0  ;;  %v1289_v14 = vld [vmem:[%s1814_s2 + $0x230] ss:$8 sps:$4 sm:$0xff]   ;;  %v1346_v15 = vld [vmem:[%s1814_s2 + $0xf4] ss:$8 sps:$4 sm:$0xff]   ;;  %v1297_v16 = vld [vmem:[%s1814_s2 + $0x244] ss:$8 sps:$4 sm:$0xff]  }
  0x1a   :  { %v1348_v17 = vld [vmem:[%s1814_s2 + $0xf0] ss:$8 sps:$4 sm:$0xff]   ;;  %v1303_v20 = vld [vmem:[%s1814_s2 + $0x254] ss:$8 sps:$4 sm:$0xff]   ;;  %v1357_v22 = vld [vmem:[%s1814_s2 + $0x300] ss:$8 sps:$4 sm:$0xff]  }
  0x1b   :  { %712 = vmatpush1.bf16.msra.mxu0 %v1231_v18  ;;  %669 = vmatpush1.bf16.msra.mxu1 %v1288_v35  ;;  %v1295_v18 = vld [vmem:[%s1814_s2 + $0x240] ss:$8 sps:$4 sm:$0xff]   ;;  %v1301_v23 = vld [vmem:[%s1814_s2 + $0x250] ss:$8 sps:$4 sm:$0xff]   ;;  %v1315_v27 = vld [vmem:[%s1814_s2 + $0x274] ss:$8 sps:$4 sm:$0xff]  }
  0x1c   :  { %713 = vmatprep.subr.bf16.mxu0 %v1232_v19  ;;  %670 = vmatprep.subr.bf16.mxu1 %v1292_v37  ;;  %v1359_v19 = vld [vmem:[%s1814_s2 + $0x304] ss:$8 sps:$4 sm:$0xff]   ;;  %v1307_v26 = vld [vmem:[%s1814_s2 + $0x260] ss:$8 sps:$4 sm:$0xff]   ;;  %v1313_v29 = vld [vmem:[%s1814_s2 + $0x270] ss:$8 sps:$4 sm:$0xff]  }
  0x1d   :  { %v1321_v31 = vld [vmem:[%s1814_s2 + $0x284] ss:$8 sps:$4 sm:$0xff]   ;;  %v1319_v33 = vld [vmem:[%s1814_s2 + $0x280] ss:$8 sps:$4 sm:$0xff]   ;;  %v1327_v35 = vld [vmem:[%s1814_s2 + $0x294] ss:$8 sps:$4 sm:$0xff]  }
  0x1e   :  { %v1325_v37 = vld [vmem:[%s1814_s2 + $0x290] ss:$8 sps:$4 sm:$0xff]  }
  0x1f   :  { %714 = vmatpush1.bf16.msra.mxu0 %v1234_v24  ;;  %671 = vmatpush1.bf16.msra.mxu1 %v1294_v39  ;;  %v1365_v24 = vld [vmem:[%s1816_s4 + $0x40] sm:$0xff]  }
  0x20   :  { %715 = vmatprep.subr.bf16.mxu0 %v1235_v25  ;;  %672 = vmatprep.subr.bf16.mxu1 %v1298_v41  ;;  %v1309_v25 = vld [vmem:[%s1814_s2 + $0x264] ss:$8 sps:$4 sm:$0xff]   ;;  %v1331_v39 = vld [vmem:[%s1814_s2 + $0x2a0] ss:$8 sps:$4 sm:$0xff]   ;;  %v1337_v41 = vld [vmem:[%s1814_s2 + $0x2b0] ss:$8 sps:$4 sm:$0xff]  }
  0x23   :  { %716 = vmatpush1.bf16.msra.mxu0 %v1237_v28  ;;  %673 = vmatpush1.bf16.msra.mxu1 %v1300_v43  ;;  %v1270_v28 = vld [vmem:[%s1815_s0 + $0x18] ss:$0 sps:$4 sm:$0xff]   ;;  %v1343_v43 = vld [vmem:[%s1814_s2 + $0x2c0] ss:$8 sps:$4 sm:$0xff]  }
  0x24   :  { %717 = vmatprep.subr.bf16.mxu0 %v1238_v30  ;;  %674 = vmatprep.subr.bf16.mxu1 %v1304_v45  ;;  %v1367_v30 = vld [vmem:[%s1816_s4 + $0x48] sm:$0xff]   ;;  %v1349_v45 = vld [vmem:[%s1814_s2 + $0x2d0] ss:$8 sps:$4 sm:$0xff]  }
  0x27   :  { %718 = vmatpush1.bf16.msra.mxu0 %v1240_v32  ;;  %675 = vmatpush1.bf16.msra.mxu1 %v1306_v47  ;;  %v1368_v32 = vld [vmem:[%s1816_s4 + $0x8] sm:$0xff]  }
  0x28   :  { %719 = vmatprep.subr.bf16.mxu0 %v1241_v34  ;;  %676 = vmatprep.subr.bf16.mxu1 %v1310_v49  ;;  %v1369_v34 = vld [vmem:[%s1816_s4 + $0x50] sm:$0xff]   ;;  %v1354_v47 = vld [vmem:[%s1814_s2 + $0x2e0] ss:$8 sps:$4 sm:$0xff]  }
  0x29   :  { %v1360_v49 = vld [vmem:[%s1814_s2 + $0x2f0] ss:$8 sps:$4 sm:$0xff]  }
  0x2b   :  { %720 = vmatpush1.bf16.msra.mxu0 %v1243_v36  ;;  %677 = vmatpush1.bf16.msra.mxu1 %v1312_v51  ;;  %v1370_v36 = vld [vmem:[%s1816_s4 + $0x10] sm:$0xff]   ;;  %v1371_v51 = vld [vmem:[%s1816_s4 + $0x58] sm:$0xff]  }
  0x2c   :  { %721 = vmatprep.subr.bf16.mxu0 %v1244_v38  ;;  %678 = vmatprep.subr.bf16.mxu1 %v1316_v53  ;;  %v1333_v38 = vld [vmem:[%s1814_s2 + $0x2a4] ss:$8 sps:$4 sm:$0xff]  }
  0x2d   :  { %v1373_v53 = vld [vmem:[%s1816_s4 + $0x60] sm:$0xff]  }
  0x2f   :  { %722 = vmatpush1.bf16.msra.mxu0 %v1246_v40  ;;  %679 = vmatpush1.bf16.msra.mxu1 %v1318_v55  ;;  %v1339_v40 = vld [vmem:[%s1814_s2 + $0x2b4] ss:$8 sps:$4 sm:$0xff]   ;;  %v1375_v55 = vld [vmem:[%s1816_s4 + $0x68] sm:$0xff]  }
  0x30   :  { %723 = vmatprep.subr.bf16.mxu0 %v1247_v42  ;;  %680 = vmatprep.subr.bf16.mxu1 %v1322_v57  ;;  %v1345_v42 = vld [vmem:[%s1814_s2 + $0x2c4] ss:$8 sps:$4 sm:$0xff]   ;;  %v1377_v57 = vld [vmem:[%s1816_s4 + $0x70] sm:$0xff]  }
  0x33   :  { %724 = vmatpush1.bf16.msra.mxu0 %v1249_v44  ;;  %681 = vmatpush1.bf16.msra.mxu1 %v1324_v60  ;;  %v1351_v44 = vld [vmem:[%s1814_s2 + $0x2d4] ss:$8 sps:$4 sm:$0xff]  }
  0x34   :  { %725 = vmatprep.subr.bf16.mxu0 %v1250_v46  ;;  %682 = vmatprep.subr.bf16.mxu1 %v1328_v63  ;;  %v1356_v46 = vld [vmem:[%s1814_s2 + $0x2e4] ss:$8 sps:$4 sm:$0xff]   ;;  %v1380_v60 = vld [vmem:[%s1816_s4 + $0x38] sm:$0xff]  }
  0x37   :  { %726 = vmatpush1.bf16.msra.mxu0 %v1252_v48  ;;  %683 = vmatpush1.bf16.msra.mxu1 %v1330_v4  ;;  %v1362_v48 = vld [vmem:[%s1814_s2 + $0x2f4] ss:$8 sps:$4 sm:$0xff]  }
  0x38   :  { %727 = vmatprep.subr.bf16.mxu0 %v1256_v50  ;;  %684 = vmatprep.subr.bf16.mxu1 %v1334_v6  ;;  %v1056_v50 = vcombine.low %v1633_v5, %v1633_v5  ;;  %v130_v6 = vlaneseq }
  0x3b   :  { %728 = vmatpush1.bf16.msra.mxu0 %v1258_v52  ;;  %685 = vmatpush1.bf16.msra.mxu1 %v1336_v11  ;;  %v1372_v52 = vld [vmem:[%s1816_s4 + $0x18] sm:$0xff]  }
  0x3c   :  { %729 = vmatprep.subr.bf16.mxu0 %v1262_v54  ;;  %686 = vmatprep.subr.bf16.mxu1 %v1340_v12  ;;  %v1374_v54 = vld [vmem:[%s1816_s4 + $0x20] sm:$0xff]  }
  0x3f   :  { %730 = vmatpush1.bf16.msra.mxu0 %v1264_v56  ;;  %687 = vmatpush1.bf16.msra.mxu1 %v1342_v13  ;;  %v1376_v56 = vld [vmem:[%s1816_s4 + $0x28] sm:$0xff]  }
  0x40   :  { %740 = vmatprep.subr.bf16.mxu0 %v1273_v58  ;;  %688 = vmatprep.subr.bf16.mxu1 %v1346_v15  ;;  %v1378_v58 = vld [vmem:[%s1816_s4 + $0x30] sm:$0xff]  }
  0x42   :  { %732 = vmatmul.mubr.bf16.vlgmr.msra.gmra.mrb[0].mxu0 %v1054_v59  ;;  %v1379_v59 = vld [vmem:[%s1816_s4 + $0x78] sm:$0xff]  }
  0x43   :  { %741 = vmatpush1.bf16.msra.mxu0 %v1271_v62  ;;  %772 = vmatprep.mubr.bf16.mxu0 %v1057_v7  ;;  %v131_v7 = vshrl.u32 %v130_v6, 7 }
  0x44   :  { %742 = vmatprep.subr.bf16.mxu0 %v1279_v2  ;;  %689 = vmatpush1.bf16.msra.mxu1 %v1348_v17 }
  0x45   :  { %781 = vmatprep.subr.bf16.mxu1 %v1359_v19 }
  0x47   :  { %743 = vmatpush1.bf16.msra.mxu0 %v1277_v3  ;;  %691 = vmatmul.mubr.bf16.vlgmr.msra.gmra.mrb[0].mxu1 %v1052_v21 }
  0x48   :  { %744 = vmatprep.subr.bf16.mxu0 %v1285_v8  ;;  %782 = vmatpush1.bf16.msra.mxu1 %v1357_v22  ;;  %v132_v8 = vsub.s32 0, %v131_v7 }
  0x49   :  { %813 = vmatprep.mubr.bf16.mxu1 %v1389_v1  ;;  %1176 = vmatprep.subr.bf16.mxu1 %v1365_v24  ;;  %v1366_v1 = vld [vmem:[%s1816_s4] sm:$0xff]  }
  0x4b   :  { %745 = vmatpush1.bf16.msra.mxu0 %v1283_v9  ;;  %v128_v9 = vld [vmem:[%s1817_s3] sm:$0x3] }
  0x4c   :  { %746 = vmatprep.subr.bf16.mxu0 %v1291_v10  ;;  %v136_v10 = vsub.s32 1, %v131_v7  ;;  %v133_v11 = vrot.slane %v128_v9, %v132_v8 }
  0x4e   :  { %v137_v12 = vrot.slane %v128_v9, %v136_v10 }
  0x4f   :  { %747 = vmatpush1.bf16.msra.mxu0 %v1289_v14  ;;  %1157 = vmatmul.mubr.msk.bf16.vlgmr.msra.gmra.mrb[4].mxu1 %vm654_vm0, %v1270_v28 }
  0x50   :  { %748 = vmatprep.subr.bf16.mxu0 %v1297_v16  ;;  %1177 = vmatpush3.bf16.msra.mxu1 %v1366_v1 }
  0x51   :  { %1178 = vmatprep.subr.bf16.mxu1 %v1367_v30 }
  0x53   :  { %749 = vmatpush1.bf16.msra.mxu0 %v1295_v18 }
  0x54   :  { %750 = vmatprep.subr.bf16.mxu0 %v1303_v20  ;;  %1179 = vmatpush3.bf16.msra.mxu1 %v1368_v32 }
  0x55   :  { %1180 = vmatprep.subr.bf16.mxu1 %v1369_v34 }
  0x57   :  { %751 = vmatpush1.bf16.msra.mxu0 %v1301_v23 }
  0x58   :  { %752 = vmatprep.subr.bf16.mxu0 %v1309_v25  ;;  %1181 = vmatpush3.bf16.msra.mxu1 %v1370_v36 }
  0x59   :  { %1182 = vmatprep.subr.bf16.mxu1 %v1371_v51 }
  0x5b   :  { %753 = vmatpush1.bf16.msra.mxu0 %v1307_v26 }
  0x5c   :  { %754 = vmatprep.subr.bf16.mxu0 %v1315_v27  ;;  %1183 = vmatpush3.bf16.msra.mxu1 %v1372_v52  ;;  %v1002_v27 = vand.u32 127, %v130_v6 }
  0x5d   :  { %1184 = vmatprep.subr.bf16.mxu1 %v1373_v53 }
  0x5e   :  { %vm1003_vm1 = vcmp.lt.s32.totalorder %v1002_v27, 10 }
  0x5f   :  { %755 = vmatpush1.bf16.msra.mxu0 %v1313_v29  ;;  %v1158_v29 = vld [vmem:[%s1818_s5] ss:$0 sm:$0xff] }
  0x60   :  { %756 = vmatprep.subr.bf16.mxu0 %v1321_v31  ;;  %1185 = vmatpush3.bf16.msra.mxu1 %v1374_v54  ;;  %v1390_v54 = vmov 0.0  }
  0x61   :  { %1186 = vmatprep.subr.bf16.mxu1 %v1375_v55 }
  0x63   :  { %757 = vmatpush1.bf16.msra.mxu0 %v1319_v33 }
  0x64   :  { %758 = vmatprep.subr.bf16.mxu0 %v1327_v35  ;;  %1187 = vmatpush3.bf16.msra.mxu1 %v1376_v56 }
  0x65   :  { %1188 = vmatprep.subr.bf16.mxu1 %v1377_v57 }
  0x67   :  { %759 = vmatpush1.bf16.msra.mxu0 %v1325_v37 }
  0x68   :  { %760 = vmatprep.subr.bf16.mxu0 %v1333_v38  ;;  %1189 = vmatpush3.bf16.msra.mxu1 %v1378_v58 }
  0x69   :  { %1190 = vmatprep.subr.bf16.mxu1 %v1379_v59 }
  0x6b   :  { %761 = vmatpush1.bf16.msra.mxu0 %v1331_v39 }
  0x6c   :  { %762 = vmatprep.subr.bf16.mxu0 %v1339_v40  ;;  %1191 = vmatpush3.bf16.msra.mxu1 %v1380_v60 }
  0x6f   :  { %763 = vmatpush1.bf16.msra.mxu0 %v1337_v41 }
  0x70   :  { %764 = vmatprep.subr.bf16.mxu0 %v1345_v42 }
  0x73   :  { %765 = vmatpush1.bf16.msra.mxu0 %v1343_v43 }
  0x74   :  { %766 = vmatprep.subr.bf16.mxu0 %v1351_v44  ;;  %v1028_v44 = vld [vmem:[%s1820_s1] sm:$0xff] }
  0x77   :  { %767 = vmatpush1.bf16.msra.mxu0 %v1349_v45 }
  0x78   :  { %768 = vmatprep.subr.bf16.mxu0 %v1356_v46 }
  0x7b   :  { %769 = vmatpush1.bf16.msra.mxu0 %v1354_v47 }
  0x7c   :  { %770 = vmatprep.subr.bf16.mxu0 %v1362_v48 }
  0x7f   :  { %771 = vmatpush1.bf16.msra.mxu0 %v1360_v49 }
  0x82   :  { %773 = vmatmul.mubr.bf16.vlgmr.msra.gmra.mrb[0].mxu0 %v1056_v50 }
 0x11a   :  { %v692_v61 = vpop.f32.mrb[0].mxu1 }
 0x11b   :  { %v694_v62 = vpop.f32.mrb[1].mxu1  ;;  %v693_v13 = vadd.f32 %v692_v61, %v133_v11 }
 0x11c   :  { %v696_v63 = vpop.f32.mrb[2].mxu1  ;;  %v695_v14 = vadd.f32 %v694_v62, %v137_v12 }
 0x11d   :  { %v697_v0 = vpop.f32.mrb[3].mxu1 }
 0x122   :  { %v815_v2 = vpop.f32.mrb[4].mxu1 }
 0x123   :  { %v817_v3 = vpop.f32.mrb[5].mxu1 }
 0x124   :  { %v819_v4 = vpop.f32.mrb[6].mxu1 }
 0x125   :  { %v820_v5 = vpop.f32.mrb[7].mxu1 }
 0x155   :  { %v774_v15 = vpop.f32.mrb[0].mxu0 }
 0x156   :  { %v1199_v16 = vadd.f32 %v774_v15, %v693_v13  ;;  %v776_v17 = vpop.f32.mrb[1].mxu0 }
 0x157   :  { %v1202_v18 = vadd.f32 %v776_v17, %v695_v14  ;;  %v778_v19 = vpop.f32.mrb[2].mxu0 }
 0x158   :  { %v1200_v20 = vadd.f32 %v1199_v16, %v815_v2  ;;  %v779_v21 = vpop.f32.mrb[3].mxu0 }
 0x159   :  { %v1203_v22 = vadd.f32 %v1202_v18, %v817_v3 }
 0x15a   :  { %v822_v23 = vmax.f32 %v1200_v20, 0.0 }
 0x15b   :  { %v823_v24 = vmax.f32 %v1203_v22, 0.0 }
 0x15c   :  { %v824_v26 = vpack.c.bf16 %v822_v23, %v822_v23 }
 0x15d   :  { %v825_v25 = vpack.c.bf16 %v823_v24, %v823_v24 }
 0x15f   :  { %993 = vmatprep.mubr.bf16.mxu1 %v825_v25 }
 0x160   :  { %994 = vmatmul.mubr.bf16.vlgmr.msra.gmra.mrb[8].mxu1 %v824_v26 }
 0x233   :  { %v1192_v28 = vpop.f32.mrb[8].mxu1 }
 0x234   :  { %v1193_v1 = vpop.f32.mrb[9].mxu1 }
 0x235   :  { %v1194_v30 = vadd.f32 %v1193_v1, %v1192_v28  ;;  %v1195_v31 = vpop.f32.mrb[10].mxu1 }
 0x236   :  { %v1196_v32 = vpop.f32.mrb[11].mxu1 }
 0x237   :  { %v996_v33 = vadd.f32 %v1194_v30, %v1158_v29 }
 0x239   :  { %v1004_v34 = vsel %vm1003_vm1, %v996_v33, -inf }
 0x23a   :  { %1005 = vmax.xlane.f32.xlu0 %v1004_v34 }
 0x2c7   :  { %v1006_v35 = vpop.xlane.xlu0 %1005 }
 0x2c8   :  { %v1007_v36 = vsub.f32 %v1004_v34, %v1006_v35 }
 0x2ca   :  { %v1008_v37 = vmul.f32 1.442695, %v1007_v36 }
 0x2cc   :  { %1381 = vpow2.f32 %v1008_v37 }
 0x2d6   :  { %v1382_v38 = vpop.eup %1381 }
 0x2d7   :  { %1010 = vadd.xlane.f32.xlu0 %v1382_v38 }
 0x2ed   :  { %1030 = vperm.xlu0 %1210, %v1028_v44  }
 0x364   :  { %v1011_v39 = vpop.xlane.xlu0 %1010 }
 0x365   :  { %1383 = vrcp.f32 %v1011_v39 }
 0x36c   :  { %v1031_v50 = vpop.permute.xlu0 %1030 }
 0x36d   :  { %vm1032_vm2 = vcmp.eq.s32.totalorder %v1002_v27, %v1031_v50 }
 0x36e   :  { %v1175_v55 = vsel %vm1032_vm2, 1.0, %v1390_v54 }
 0x36f   :  { %v1384_v40 = vpop.eup %1383 }
 0x370   :  { %v1013_v41 = vmul.f32 %v1384_v40, %v1382_v38 }
 0x372   :  { %v1016_v42 = vsel %vm1003_vm1, %v1013_v41, -inf  ;;  %v1014_v43 = vpack.c.bf16 %v1013_v41, %v1013_v41 }
 0x373   :  { %1017 = vmax.xlane.f32.xlu1 %v1016_v42 }
 0x374   :  { %1015 = vst [vmem:[%s1819_s6] sm:$0xf] %v1014_v43 }
 0x400   :  { %v1018_v45 = vpop.xlane.xlu1 %1017 }
 0x401   :  { %v1019_v46 = vsub.f32 %v1016_v42, %v1018_v45 }
 0x403   :  { %v1020_v47 = vmul.f32 1.442695, %v1019_v46 }
 0x405   :  { %1385 = vpow2.f32 %v1020_v47 }
 0x40f   :  { %v1386_v48 = vpop.eup %1385 }
 0x410   :  { %1022 = vadd.xlane.f32.xlu1 %v1386_v48 }
 0x49d   :  { %v1023_v49 = vpop.xlane.xlu1 %1022 }
 0x49e   :  { %1387 = vlog2.f32 %v1023_v49 }
 0x4a8   :  { %v1388_v51 = vpop.eup %1387 }
 0x4a9   :  { %v1025_v52 = vmul.f32 0.6931472, %v1388_v51 }
 0x4ab   :  { %v1026_v53 = vadd.f32 %v1025_v52, %v1018_v45 }
 0x4ad   :  { %v1027_v56 = vsub.f32 %v1013_v41, %v1026_v53 }
 0x4af   :  { %v1035_v57 = vmul.f32 %v1175_v55, %v1027_v56 }
 0x4b1   :  { %v1036_v58 = vrot.slane %v1035_v57, 4 }
 0x4b3   :  { %v1037_v59 = vadd.f32 %v1036_v58, %v1035_v57 }
 0x4b5   :  { %v1038_v60 = vrot.slane %v1037_v59, 2 }
 0x4b7   :  { %v1039_v61 = vadd.f32 %v1038_v60, %v1037_v59 }
 0x4b9   :  { %v1040_v62 = vrot.slane %v1039_v61, 1 }
 0x4bb   :  { %v1041_v63 = vadd.f32 %v1040_v62, %v1039_v61 }
 0x4bd   :  { %v1042_v0 = vsub.f32 0.0, %v1041_v63 }
 0x4bf   :  { %1043 = vst [vmem:[%s1821_s7] sm:$0x1] %v1042_v0 }

</bundles_post_ra>
